<compile_context>
chip_gen: v7x
topology: tpu7x:2x2x1
jax: 0.10.0
libtpu: 0.0.40
codegen_flags: <defaults>
</compile_context>

<pallas_src>
import math

import jax
import jax.numpy as jnp
from jax.experimental import pallas as pl
from jax.experimental.pallas import tpu as pltpu


def _make_positional_encoding(max_len: int, d_model: int) -> jnp.ndarray:
    """Matches PositionalEncoding.__init__ exactly (note: log(1000.0), as written)."""
    position = jnp.arange(0, max_len, dtype=jnp.float32)[:, None]          # (max_len, 1)
    v = jnp.arange(0, d_model, 2, dtype=jnp.float32)
    v = v * -(math.log(1000.0) / d_model)
    div_term = jnp.exp(v)                                                   # (d_model/2,)
    angles = position * div_term                                            # (max_len, d_model/2)
    pe = jnp.zeros((max_len, d_model), dtype=jnp.float32)
    pe = pe.at[:, 0::2].set(jnp.sin(angles))
    pe = pe.at[:, 1::2].set(jnp.cos(angles))
    return pe                                                               # (max_len, d_model)


def _process_input_kernel(x_ref, ws_ref, peb_ref, o_ref):
    # x_ref:  (tM, dim)        -- row tile of flattened (B*S, dim) input
    # ws_ref: (dim, d_model)   -- W * sqrt(d_model), resident across the grid
    # peb_ref:(tM, d_model)    -- folded (pe + b*sqrt(d_model)) tile
    # o_ref:  (tM, d_model)
    y = jnp.dot(x_ref[...], ws_ref[...], preferred_element_type=jnp.float32)
    o_ref[...] = (y + peb_ref[...]).astype(o_ref.dtype)
    # TODO(synk): training-mode dropout (pltpu.prng_* mask) not implemented;
    # eval-mode dropout == identity.


def _choose_row_tiling(B: int, S: int, target_rows: int):
    """Pick the row-tile size tM for the flattened (B*S, dim) input.

    Returns (tM, mode):
      mode == "multi_seq": tM = gb*S, gb | B   (PE tile resident in VMEM)
      mode == "sub_seq":   tM | S, tM % 8 == 0 (PE block indexed with i % (S//tM))
    Falls back to the whole array as one block (always legal).
    """
    # Prefer whole-sequence tiles (largest that fits the target).
    best_gb = None
    for gb in range(1, B + 1):
        if B % gb:
            continue
        t = gb * S
        if t % 8 == 0 and t <= target_rows:
            best_gb = gb
    if best_gb is not None:
        return best_gb * S, "multi_seq"
    # Sequence longer than target: split within sequences.
    best_t = None
    for t in range(8, min(S, target_rows) + 1, 8):
        if S % t == 0:
            best_t = t
    if best_t is not None:
        return best_t, "sub_seq"
    # Fallback: single block covering everything (block == full array dims).
    return B * S, "multi_seq"


def process_input(x, w, b, pe_full, *, compute_dtype=None, target_rows=1024):
    """x: (B, S, dim); w: (dim, d_model); b: (d_model,); pe_full: (max_len, d_model).

    compute_dtype: optional dtype (e.g. jnp.bfloat16) for the matmul operands;
    accumulation stays f32 and the PE/bias add is done in f32.
    """
    B, S, dim = x.shape
    d_model = w.shape[1]
    scale = math.sqrt(d_model)

    # ---- host-side fold: (xW + b)*s + pe == x(W*s) + (b*s + pe) -------------
    ws = w.astype(jnp.float32) * scale                                      # (dim, d_model)
    pe_b = pe_full[:S, :] + b.astype(jnp.float32)[None, :] * scale          # (S, d_model)

    # ---- row tiling over flattened (B*S) ------------------------------------
    tM, mode = _choose_row_tiling(B, S, target_rows)
    n_tiles = (B * S) // tM
    grid = (n_tiles,)

    x2 = x.reshape(B * S, dim)                                              # free (contiguous)

    if mode == "multi_seq":
        gb = tM // S
        pe_arr = jnp.tile(pe_b, (gb, 1)) if gb > 1 else pe_b                # (tM, d_model)
        pe_spec = pl.BlockSpec((tM, d_model), lambda i: (0, 0))             # resident
    else:  # "sub_seq": tM divides S
        n_pe_blocks = S // tM
        pe_arr = pe_b                                                       # (S, d_model)
        pe_spec = pl.BlockSpec((tM, d_model), lambda i: (i % n_pe_blocks, 0))

    if compute_dtype is not None:
        x2 = x2.astype(compute_dtype)
        ws = ws.astype(compute_dtype)

    in_itemsize = jnp.dtype(x2.dtype).itemsize
    out_itemsize = jnp.dtype(x.dtype).itemsize

    # ---- VMEM budget (double-buffered x/pe/out tiles + resident folded W) ---
    vmem_need = (
        2 * tM * dim * in_itemsize          # x tile, double-buffered
        + 2 * tM * d_model * out_itemsize   # out tile, double-buffered
        + 2 * tM * d_model * 4              # PE tile (resident or pipelined)
        + dim * d_model * in_itemsize       # resident folded W
    )
    vmem_limit = int(min(max(4 * vmem_need, 16 * 1024 * 1024), 64 * 1024 * 1024))

    cost = pl.CostEstimate(
        flops=2 * B * S * dim * d_model,
        transcendentals=0,
        bytes_accessed=(x2.size * in_itemsize
                        + ws.size * in_itemsize
                        + pe_arr.size * 4
                        + B * S * d_model * out_itemsize),
    )

    out2 = pl.pallas_call(
        _process_input_kernel,
        out_shape=jax.ShapeDtypeStruct((B * S, d_model), x.dtype),
        grid_spec=pltpu.PrefetchScalarGridSpec(
            num_scalar_prefetch=0,
            grid=grid,
            in_specs=[
                pl.BlockSpec((tM, dim), lambda i: (i, 0)),        # x rows
                pl.BlockSpec((dim, d_model), lambda i: (0, 0)),   # folded W (resident)
                pe_spec,                                          # folded PE (+ bias)
            ],
            out_specs=pl.BlockSpec((tM, d_model), lambda i: (i, 0)),
        ),
        compiler_params=pltpu.CompilerParams(
            dimension_semantics=("parallel",),   # row-tile axis shards across TCs
            vmem_limit_bytes=vmem_limit,
        ),
        cost_estimate=cost,
    )(x2, ws, pe_arr)

    return out2.reshape(B, S, d_model)


def process_input_ref(x, w, b, pe_full):
    """Plain-JAX reference mirroring the PyTorch forward (eval mode)."""
    d_model = w.shape[1]
    S = x.shape[1]
    y = jnp.einsum("bsd,dm->bsm", x, w) + b
    y = y * math.sqrt(d_model)
    y = y + pe_full[None, :S, :]
    return y


def _make_params(key, dim, d_model):
    kw, kb = jax.random.split(key)
    bound = 1.0 / math.sqrt(dim)   # PyTorch nn.Linear default init bound
    w = jax.random.uniform(kw, (dim, d_model), minval=-bound, maxval=bound,
                           dtype=jnp.float32)
    b = jax.random.uniform(kb, (d_model,), minval=-bound, maxval=bound,
                           dtype=jnp.float32)
    return w, b


if __name__ == "__main__":
    key = jax.random.PRNGKey(0)
    kx1, kx2, kp = jax.random.split(key, 3)

    # ---- Test 1: small shapes consistent with the module (multi_seq path) ---
    B, S, dim, d_model = 2, 8, 16, 32
    x = jax.random.normal(kx1, (B, S, dim), dtype=jnp.float32)
    w, b = _make_params(kp, dim, d_model)
    pe_full = _make_positional_encoding(max_len=5000, d_model=d_model)

    ref = process_input_ref(x, w, b, pe_full)
    out = jax.block_until_ready(process_input(x, w, b, pe_full))
    assert out.shape == (B, S, d_model)
    assert jnp.allclose(out, ref, atol=1e-4, rtol=1e-4), "f32 mismatch (multi_seq)"

    # bf16-matmul path (memory-bound optimization): loose tolerance smoke test.
    out_bf16 = jax.block_until_ready(
        process_input(x, w, b, pe_full, compute_dtype=jnp.bfloat16))
    assert out_bf16.shape == (B, S, d_model)
    assert jnp.allclose(out_bf16, ref, atol=0.3, rtol=0.06), "bf16 mismatch"

    # ---- Test 2: long-sequence path (sub_seq PE index_map) ------------------
    B2, S2 = 2, 32
    x2 = jax.random.normal(kx2, (B2, S2, dim), dtype=jnp.float32)
    ref2 = process_input_ref(x2, w, b, pe_full)
    out2 = jax.block_until_ready(
        process_input(x2, w, b, pe_full, target_rows=16))   # forces sub_seq tiling
    assert out2.shape == (B2, S2, d_model)
    assert jnp.allclose(out2, ref2, atol=1e-4, rtol=1e-4), "f32 mismatch (sub_seq)"

    print("KERNEL_OK")
</pallas_src>

<mosaic_0001>
module attributes {stable_mosaic.version = 11 : i64} {
  func.func @_process_input_kernel(%arg0: i32, %arg1: memref<16x16xf32, #tpu.memory_space<vmem>>, %arg2: memref<16x32xf32, #tpu.memory_space<vmem>>, %arg3: memref<16x32xf32, #tpu.memory_space<vmem>>, %arg4: memref<16x32xf32, #tpu.memory_space<vmem>>) attributes {dimension_semantics = [#tpu.dimension_semantics<parallel>], iteration_bounds = array<i64: 1>, scalar_prefetch = 0 : i64, scratch_operands = 0 : i64, tpu.core_type = #tpu.core_type<tc>, window_params = [{transform_indices = @transform_0, window_bounds = array<i64: 16, 16>}, {pipeline_mode = #tpu.pipeline_mode<synchronous>, transform_indices = @transform_1, window_bounds = array<i64: 16, 32>}, {pipeline_mode = #tpu.pipeline_mode<synchronous>, transform_indices = @transform_2, window_bounds = array<i64: 16, 32>}, {transform_indices = @transform_3, window_bounds = array<i64: 16, 32>}]} {
    %c0 = arith.constant 0 : index
    %c0_0 = arith.constant 0 : index
    %0 = vector.load %arg1[%c0, %c0_0] : memref<16x16xf32, #tpu.memory_space<vmem>>, vector<16x16xf32>
    %c0_1 = arith.constant 0 : index
    %c0_2 = arith.constant 0 : index
    %1 = vector.load %arg2[%c0_1, %c0_2] : memref<16x32xf32, #tpu.memory_space<vmem>>, vector<16x32xf32>
    %cst = arith.constant dense<0.000000e+00> : vector<16x32xf32>
    %2 = tpu.matmul %0, %1, %cst {dimension_numbers = #tpu.dot_dimension_numbers<[1], [0], [0], [1], [0, 0, 1, 1], [], []>} : vector<16x16xf32>, vector<16x32xf32>, vector<16x32xf32> -> vector<16x32xf32>
    %c0_3 = arith.constant 0 : index
    %c0_4 = arith.constant 0 : index
    %3 = vector.load %arg3[%c0_3, %c0_4] : memref<16x32xf32, #tpu.memory_space<vmem>>, vector<16x32xf32>
    %4 = arith.addf %2, %3 : vector<16x32xf32>
    %c0_5 = arith.constant 0 : index
    %c0_6 = arith.constant 0 : index
    %5 = vector.load %arg4[%c0_5, %c0_6] : memref<16x32xf32, #tpu.memory_space<vmem>>, vector<16x32xf32>
    tpu.vector_store %arg4[%c0_5, %c0_6], %4 {strides = array<i32>} : memref<16x32xf32, #tpu.memory_space<vmem>>, vector<16x32xf32>,
    return
  }
  func.func @transform_0(%arg0: i32) -> (i32, i32) {
    %c0_i32 = arith.constant 0 : i32
    %c0_i32_0 = arith.constant 0 : i32
    return %arg0, %c0_i32 : i32, i32
  }
  func.func @transform_1(%arg0: i32) -> (i32, i32) {
    %c0_i32 = arith.constant 0 : i32
    %c0_i32_0 = arith.constant 0 : i32
    %c0_i32_1 = arith.constant 0 : i32
    return %c0_i32, %c0_i32_0 : i32, i32
  }
  func.func @transform_2(%arg0: i32) -> (i32, i32) {
    %c0_i32 = arith.constant 0 : i32
    %c0_i32_0 = arith.constant 0 : i32
    %c0_i32_1 = arith.constant 0 : i32
    return %c0_i32, %c0_i32_0 : i32, i32
  }
  func.func @transform_3(%arg0: i32) -> (i32, i32) {
    %c0_i32 = arith.constant 0 : i32
    %c0_i32_0 = arith.constant 0 : i32
    return %arg0, %c0_i32 : i32, i32
  }
}

</mosaic_0001>

<bundles_post_ra>
// kernel: tpu_custom_call.1
= control target key start
LH: loop header
LB: loop body
LE: loop exit
PB: predicated region body
PF: predicated region fallthrough
CT: control target
= control target key end

     0   :  { %8 = vsyncpa [#allocation3], 0  ;;  %s375_s0 = inlined_call_operand.hbm [shape: f32[16,16], index: 0, kind: input, shape index: {}]   ;;  %s376_s1 = inlined_call_operand.hbm [shape: f32[16,32], index: 1, kind: input, shape index: {}]   ;;  %s377_s2 = inlined_call_operand.hbm [shape: f32[16,32], index: 2, kind: input, shape index: {}]   ;;  %s378_s3 = inlined_call_operand.hbm [shape: f32[16,32], index: 3, kind: output, shape index: {}]  }
   0x1   :  { %9 = vsyncpa [#allocation6], 0 }
   0x2   :  { %10 = vsyncpa [#allocation4], 0  ;;  %s282_s12 = smov [#allocation5]   ;;  %s283_s14 = smov [#allocation2]  }
   0x3   :  { %s28_s13 = sshll.u32 %s282_s12, 4  ;;  %s16_s15 = sshll.u32 %s283_s14, 4  ;;  %s29_s13 = int_to_ptr.vmem [resolvable:$true] %s28_s13  ;;  %s308_s15 = int_to_ptr.vmem [resolvable:$true] %s16_s15 }
   0x4   :  { %s188_s18 = scalar_lea.hbm %s376_s1, 256 }
   0x5   :  { %p189_p0 = scmp.ne.s32.totalorder %s376_s1, %s188_s18  ;;  %p192_p1 = scmp.lt.u32.totalorder %s188_s18, %s376_s1 }
   0x7   :  { %p194_p2 = pnand %p192_p1, %p189_p0 }
   0x9   :  { %197 = shalt.err (!%p194_p2)
}
   0xa   :  { %s198_s23 = scalar_lea.vmem %s29_s13, 256  ;;  %p203_p4 = scmp.lt.s32.totalorder %s29_s13, %s29_s13 }
   0xb   :  { %p199_p3 = scmp.ne.s32.totalorder %s29_s13, %s198_s23  ;;  %p204_p5 = scmp.lt.s32.totalorder %s198_s23, %s198_s23 }
   0xd   :  { %p205_p6 = por %p204_p5, %p203_p4 }
   0xf   :  { %p206_p7 = pnand %p205_p6, %p199_p3 }
  0x11   :  { %209 = shalt.err (!%p206_p7)
}
  0x12   :  { %s284_s24 = smov 128   ;;  %s285_s25 = smov 8  }
  0x13   :  { %34 = dma.hbm_to_vmem [thread:$0]  %s376_s1, 256, %s29_s13, [#allocation6], %s284_s24, %s284_s24, %s285_s25  }
  0x14   :  { %s210_s30 = scalar_lea.hbm %s375_s0, 256 }
  0x15   :  { %p211_p8 = scmp.ne.s32.totalorder %s375_s0, %s210_s30  ;;  %p214_p9 = scmp.lt.u32.totalorder %s210_s30, %s375_s0 }
  0x17   :  { %p216_p10 = pnand %p214_p9, %p211_p8 }
  0x19   :  { %219 = shalt.err (!%p216_p10)
}
  0x1a   :  { %s220_s8 = scalar_lea.vmem %s308_s15, 256  ;;  %p225_p12 = scmp.lt.s32.totalorder %s308_s15, %s308_s15 }
  0x1b   :  { %p221_p11 = scmp.ne.s32.totalorder %s308_s15, %s220_s8  ;;  %p226_p13 = scmp.lt.s32.totalorder %s220_s8, %s220_s8 }
  0x1d   :  { %p227_p0 = por %p226_p13, %p225_p12 }
  0x1f   :  { %p228_p1 = pnand %p227_p0, %p221_p11 }
  0x21   :  { %231 = shalt.err (!%p228_p1)
}
  0x22   :  { %22 = dma.hbm_to_vmem [thread:$0]  %s375_s0, 256, %s308_s15, [#allocation3], %s284_s24, %s284_s24, %s285_s25  }
  0x23   :  { %s286_s10 = smov [#allocation7]   ;;  %s232_s14 = scalar_lea.hbm %s377_s2, 256 }
  0x24   :  { %s40_s11 = sshll.u32 %s286_s10, 4  ;;  %p233_p2 = scmp.ne.s32.totalorder %s377_s2, %s232_s14  ;;  %s41_s11 = int_to_ptr.vmem [resolvable:$true] %s40_s11 }
  0x25   :  { %p236_p3 = scmp.lt.u32.totalorder %s232_s14, %s377_s2 }
  0x27   :  { %p238_p4 = pnand %p236_p3, %p233_p2 }
  0x29   :  { %241 = shalt.err (!%p238_p4)
}
  0x2a   :  { %s242_s20 = scalar_lea.vmem %s41_s11, 256  ;;  %p247_p6 = scmp.lt.s32.totalorder %s41_s11, %s41_s11 }
  0x2b   :  { %p243_p5 = scmp.ne.s32.totalorder %s41_s11, %s242_s20  ;;  %p248_p7 = scmp.lt.s32.totalorder %s242_s20, %s242_s20 }
  0x2d   :  { %p249_p8 = por %p248_p7, %p247_p6 }
  0x2f   :  { %p250_p9 = pnand %p249_p8, %p243_p5 }
  0x31   :  { %253 = shalt.err (!%p250_p9)
}
  0x32   :  { %46 = dma.hbm_to_vmem [thread:$0]  %s377_s2, 256, %s41_s11, [#allocation6], %s284_s24, %s284_s24, %s285_s25  }
  0x33   :  { %276 = dma.done.wait [#allocation3], 256  }
  0x34   :  { %277 = vsyncadd [#allocation3], 4294967040 }
  0x35   :  { %278 = dma.done.wait [#allocation6], 512  }
  0x36   :  { %279 = vsyncadd [#allocation6], 4294966784  ;;  %vm62_vm0 = vcmask 130048   ;;  %v58_v0 = vld [vmem:[#allocation5] sm:$0xff]  ;;  %v59_v1 = vld [vmem:[#allocation5 + $0x8] sm:$0xff]  ;;  %s287_s21 = smov [#allocation8]  }
  0x37   :  { %v56_v2 = vld [vmem:[#allocation2] sm:$0xff]  ;;  %v178_v3 = vpack.c.bf16 %v59_v1, %v58_v0  ;;  %v57_v4 = vld [vmem:[#allocation2 + $0x8] sm:$0xff]  ;;  %s152_s22 = sshll.u32 %s287_s21, 4  ;;  %vm144_vm1 = vcmask 261120   ;;  %s153_s22 = int_to_ptr.vmem [resolvable:$true] %s152_s22 }
  0x38   :  { %175 = vmatprep.mubr.msk.f32.mxu0 %vm62_vm0, %v56_v2  ;;  %v61_v5 = vld [vmem:[#allocation7 + $0x8] sm:$0xff]  ;;  %v60_v6 = vld [vmem:[#allocation7] sm:$0xff]  ;;  %s254_s2 = scalar_lea.vmem %s153_s22, 256  ;;  %p259_p11 = scmp.lt.s32.totalorder %s153_s22, %s153_s22 }
  0x39   :  { %179 = vmatprep.subr.bf16.mxu0 %v178_v3  ;;  %p255_p10 = scmp.ne.s32.totalorder %s153_s22, %s254_s2  ;;  %p260_p12 = scmp.lt.s32.totalorder %s254_s2, %s254_s2 }
  0x3a   :  { %181 = vmatpush3.bf16.msra.mxu0 %v178_v3 }
  0x3b   :  { %p261_p13 = por %p260_p12, %p259_p11 }
  0x3d   :  { %176 = vmatmul.mubr.msk.f32.vlgmr.msra.gmra.mrb[0].mxu0 %vm62_vm0, %v57_v4  ;;  %p262_p0 = pnand %p261_p13, %p255_p10 }
 0x110   :  { %v177_v7 = vpop.f32.mrb[0].mxu0 }
 0x111   :  { %v141_v8 = vadd.f32 %v177_v7, %v61_v5  ;;  %v135_v9 = vpop.f32.mrb[1].mxu0 }
 0x112   :  { %v136_v10 = vadd.f32 %v135_v9, %v60_v6 }
 0x113   :  { %146 = vst.msk [vmem:[#allocation8 + $0x8] sm:$0xff] %vm144_vm1, %v141_v8 }
 0x114   :  { %145 = vst.msk [vmem:[#allocation8] sm:$0xff] %vm144_vm1, %v136_v10 }
 0x115   :  { %265 = shalt.err (!%p262_p0)
}
 0x116   :  { %s266_s27 = scalar_lea.hbm %s378_s3, 256 }
 0x117   :  { %p267_p1 = scmp.ne.s32.totalorder %s378_s3, %s266_s27  ;;  %p270_p2 = scmp.lt.u32.totalorder %s266_s27, %s378_s3 }
 0x119   :  { %p272_p3 = pnand %p270_p2, %p267_p1 }
 0x11b   :  { %275 = shalt.err (!%p272_p3)
}
 0x11c   :  { %158 = dma.vmem_to_hbm [thread:$0]  %s153_s22, 256, %s378_s3, [#allocation4], %s284_s24, %s284_s24, %s285_s25  }
 0x11d   :  { %280 = dma.done.wait [#allocation4], 256  }
 0x11e   :  { %281 = vsyncadd [#allocation4], 4294967040 }
 0x11f   :  { %162 = vsyncpa [#allocation3], 1 }
 0x120   :  { %163 = vsyncpa [#allocation6], 1 }
 0x121   :  { %164 = vsyncpa [#allocation4], 1 }

</bundles_post_ra>
